<compile_context>
chip_gen: v6e
topology: v6e:2x2x1
jax: 0.10.0
libtpu: 0.0.40
codegen_flags: <defaults>
</compile_context>

<pallas_src>
import numpy as np
import jax
import jax.numpy as jnp
from jax.experimental import pallas as pl
from jax.experimental.pallas import tpu as pltpu


# ---------------------------------------------------------------------------
# Deterministic mask "parameter" initialization (glue, plain numpy).
# TODO(synk): masksembles.common.generate_masks uses a randomized search to
# build masks of width expected_size; here we build deterministic binary
# masks of the same shape / sparsity structure.
# ---------------------------------------------------------------------------
def make_masks(channels: int, n: int, scale: float) -> np.ndarray:
    expected_size = int(channels * scale * (1 - (1 - 1 / scale) ** n))
    keep = min(channels, expected_size)
    masks = np.zeros((n, expected_size), dtype=np.float64)  # module stores .double()
    for i in range(n):
        start = (i * keep) % expected_size
        idx = (start + np.arange(keep)) % expected_size
        masks[i, idx] = 1.0
    return masks


# ---------------------------------------------------------------------------
# Pallas kernel: masked multiply for one group-tile of samples.
#   x_ref : (1, g_tile, C)  input tile   (C lane-dense, group rows on sublanes)
#   m_ref : (1, 1, C)       mask row for this group (sublane broadcast)
#   o_ref : (1, g_tile, C)  output tile  (float32)
# ---------------------------------------------------------------------------
def masksembles_kernel(x_ref, m_ref, o_ref):
    x = x_ref[...].astype(jnp.float32)      # (1, g_tile, C)
    m = m_ref[...]                          # (1, 1, C) -> VPU sublane broadcast
    o_ref[...] = x * m


def masksembles1d(x: jax.Array, masks, n: int,
                  *, max_block_bytes: int = 4 * 1024 * 1024) -> jax.Array:
    N, C = x.shape
    assert N % n == 0, "batch must be divisible by n"
    group = N // n
    assert masks.shape == (n, C), "mask width must match feature dim"

    # group-major layout: (n, group, C) — last two block dims either full
    # extent or (8, 128)-aligned.
    xg = x.reshape(n, group, C)
    masks3 = jnp.asarray(masks, dtype=jnp.float32).reshape(n, 1, C)

    # Group-dim tile: whole group if it fits the per-block VMEM budget,
    # otherwise the largest multiple of 8 within budget (keeps the (8,128)
    # BlockSpec rule satisfied; ragged last tile handled by Pallas).
    bytes_per_row = C * 4  # f32 rows (output; input is <= this)
    if group <= 8 or group * bytes_per_row <= max_block_bytes:
        g_tile = group
    else:
        g_tile = max(8, min(group, max_block_bytes // bytes_per_row) // 8 * 8)
    num_t = pl.cdiv(group, g_tile)

    out = pl.pallas_call(
        masksembles_kernel,
        out_shape=jax.ShapeDtypeStruct((n, group, C), jnp.float32),
        grid=(n, num_t),
        in_specs=[
            pl.BlockSpec((1, g_tile, C), lambda g, t: (g, t, 0)),
            pl.BlockSpec((1, 1, C), lambda g, t: (g, 0, 0)),
        ],
        out_specs=pl.BlockSpec((1, g_tile, C), lambda g, t: (g, t, 0)),
        compiler_params=pltpu.CompilerParams(
            dimension_semantics=("parallel", "parallel"),
        ),
    )(xg, masks3)

    return out.reshape(N, C)


if __name__ == "__main__":
    # Module config: Masksembles1DDynamicSize(channels=16, n=4, scale=2.0)
    channels, n, scale = 16, 4, 2.0
    masks = make_masks(channels, n, scale)           # (n, expected_size)
    features = masks.shape[1]                        # input feature dim = mask width
    N = 8                                            # small batch divisible by n

    key = jax.random.PRNGKey(0)
    x = jax.random.normal(key, (N, features), dtype=jnp.float32)

    out = masksembles1d(x, masks, n)
    out = jax.block_until_ready(out)

    # Reference (pure numpy) check of the forward semantics.
    x_np = np.asarray(x)
    group = N // n
    ref = np.empty((N, features), dtype=np.float32)
    for b in range(N):
        m = masks[b // group]                                   # (C,) double
        ref[b] = (x_np[b].astype(np.float64) * m).astype(np.float32)

    np.testing.assert_allclose(np.asarray(out), ref, rtol=0, atol=0)
    assert out.shape == (N, features) and out.dtype == jnp.float32

    print("KERNEL_OK")
</pallas_src>

<mosaic_0001>
module attributes {stable_mosaic.version = 11 : i64} {
  func.func @masksembles_kernel(%arg0: i32, %arg1: i32, %arg2: memref<1x2x30xf32, #tpu.memory_space<vmem>>, %arg3: memref<1x1x30xf32, #tpu.memory_space<vmem>>, %arg4: memref<1x2x30xf32, #tpu.memory_space<vmem>>) attributes {dimension_semantics = [#tpu.dimension_semantics<parallel>, #tpu.dimension_semantics<parallel>], iteration_bounds = array<i64: 4, 1>, scalar_prefetch = 0 : i64, scratch_operands = 0 : i64, tpu.core_type = #tpu.core_type<tc>, window_params = [{transform_indices = @transform_0, window_bounds = array<i64: 1, 2, 30>}, {transform_indices = @transform_1, window_bounds = array<i64: 1, 1, 30>}, {transform_indices = @transform_2, window_bounds = array<i64: 1, 2, 30>}]} {
    %c0 = arith.constant 0 : index
    %c0_0 = arith.constant 0 : index
    %c0_1 = arith.constant 0 : index
    %0 = vector.load %arg2[%c0, %c0_0, %c0_1] : memref<1x2x30xf32, #tpu.memory_space<vmem>>, vector<1x2x30xf32>
    %c0_2 = arith.constant 0 : index
    %c0_3 = arith.constant 0 : index
    %c0_4 = arith.constant 0 : index
    %1 = vector.load %arg3[%c0_2, %c0_3, %c0_4] : memref<1x1x30xf32, #tpu.memory_space<vmem>>, vector<1x1x30xf32>
    %2 = vector.broadcast %1 : vector<1x1x30xf32> to vector<1x2x30xf32>
    %3 = arith.mulf %0, %2 : vector<1x2x30xf32>
    %c0_5 = arith.constant 0 : index
    %c0_6 = arith.constant 0 : index
    %c0_7 = arith.constant 0 : index
    %4 = vector.load %arg4[%c0_5, %c0_6, %c0_7] : memref<1x2x30xf32, #tpu.memory_space<vmem>>, vector<1x2x30xf32>
    tpu.vector_store %arg4[%c0_5, %c0_6, %c0_7], %3 {strides = array<i32>} : memref<1x2x30xf32, #tpu.memory_space<vmem>>, vector<1x2x30xf32>,
    return
  }
  func.func @transform_0(%arg0: i32, %arg1: i32) -> (i32, i32, i32) {
    %c0_i32 = arith.constant 0 : i32
    %c0_i32_0 = arith.constant 0 : i32
    return %arg0, %arg1, %c0_i32 : i32, i32, i32
  }
  func.func @transform_1(%arg0: i32, %arg1: i32) -> (i32, i32, i32) {
    %c0_i32 = arith.constant 0 : i32
    %c0_i32_0 = arith.constant 0 : i32
    %c0_i32_1 = arith.constant 0 : i32
    return %arg0, %c0_i32, %c0_i32_0 : i32, i32, i32
  }
  func.func @transform_2(%arg0: i32, %arg1: i32) -> (i32, i32, i32) {
    %c0_i32 = arith.constant 0 : i32
    %c0_i32_0 = arith.constant 0 : i32
    return %arg0, %arg1, %c0_i32 : i32, i32, i32
  }
}

</mosaic_0001>

<bundles_post_ra>
// kernel: tpu_custom_call.1
= control target key start
LH: loop header
LB: loop body
LE: loop exit
PB: predicated region body
PF: predicated region fallthrough
CT: control target
= control target key end

     0   :  { %7 = vsyncpa [#allocation3], 0  ;;  %s740_s0 = inlined_call_operand.hbm [shape: f32[4,2,30], index: 0, kind: input, shape index: {}]   ;;  %s741_s1 = inlined_call_operand.hbm [shape: f32[4,1,30], index: 1, kind: input, shape index: {}]   ;;  %s742_s2 = inlined_call_operand.hbm [shape: f32[4,2,30], index: 2, kind: output, shape index: {}]  }
   0x1   :  { %9 = vsyncpa [#allocation3 + $0x1], 0 }
   0x2   :  { %10 = vsyncpa [#allocation6], 0 }
   0x3   :  { %12 = vsyncpa [#allocation6 + $0x1], 0 }
   0x4   :  { %13 = vsyncpa [#allocation4], 0 }
   0x5   :  { %15 = vsyncpa [#allocation4 + $0x1], 0  ;;  %s578_s9 = smov 0   ;;  %s580_s10 = smov 0  }
   0x6   :  { %s582_s11 = smov 0   ;;  %s584_s12 = smov 0  }
   0x7   :  { %s586_s13 = smov 0   ;;  %s588_s14 = smov 0  }
   0x8 LB: > { %s336_s15 = sadd.s32 4294967295, %s558_s14   ;;  %s337_s16 = sadd.s32 4294967294, %s558_s14   ;;  %s558_s14 = sphi %s588_s14, %s21_s14   ;;  %s554_s13 = sphi %s586_s13, %s753_s13   ;;  %s550_s12 = sphi %s584_s12, %s752_s12   ;;  %s546_s11 = sphi %s582_s11, %s751_s11   ;;  %s542_s10 = sphi %s580_s10, %s750_s10   ;;  %s538_s9 = sphi %s578_s9, %s749_s9  }
   0x9   : > { %s33_s17 = sadd.s32 1, %s554_s13  ;;  %s42_s18 = sadd.s32 1, %s546_s11 }
   0xa   : > { %p35_p0 = scmp.ge.s32.totalorder %s33_s17, 4  ;;  %p49_p1 = scmp.ne.s32.totalorder %s546_s11, %s542_s10 }
   0xb   : > { %p50_p2 = scmp.eq.s32.totalorder %s558_s14, 0  ;;  %p55_p3 = scmp.ne.s32.totalorder %s542_s10, %s538_s9 }
   0xc   : > { %s755_s17 = smov (%p35_p0, %s33_s17), 0  ;;  %p56_p5 = scmp.eq.s32.totalorder %s336_s15, 0 }
   0xd   : > { %p619_p4 = por %p50_p2, %p49_p1  ;;  %s37_s20 = ssub.s32 %s554_s13, %s755_s17 }
   0xe   : > { %p107_p6 = scmp.eq.s32.totalorder %s336_s15, 3  ;;  %p40_p7 = scmp.eq.s32.totalorder %s37_s20, 0 }
   0xf   : > { %p625_p8 = por %p56_p5, %p55_p3  ;;  %p113_p10 = scmp.eq.s32.totalorder %s337_s16, 3 }
  0x10   : > { %p629_p9 = por %p107_p6, %p49_p1  ;;  %p368_p12 = scmp.lt.s32.totalorder %s558_s14, 4 }
  0x11   : > { %s634_s23 = scalar_select %p40_p7, %s546_s11, %s42_s18  }
  0x12   : > { %p636_p11 = por %p113_p10, %p55_p3  ;;  %s642_s25 = sand.u32 1, %s546_s11  }
  0x13   : > { %s340_s26 = sshll.u32 %s642_s25, 1  ;;  %s341_s27 = sshll.u32 %s554_s13, 5 }
  0x14   : > { %s143_s30 = scalar_lea.hbm %s740_s0, %s341_s27  ;;  %s137_s3 = scalar_lea.vmem [#allocation2], %s340_s26 }
  0x15   : > { %s145_s4 = sshll.u32 %s137_s3, 4  ;;  %p651_p13 = pnand %p368_p12, %p619_p4  ;;  %s146_s4 = int_to_ptr.vmem [resolvable:$true] %s145_s4 }
  0x16   : > { %p343_p0 = scmp.ge.s32.totalorder %s558_s14, 1  ;;  %p167_p1 = scmp.lt.s32.totalorder %s558_s14, 5 }
  0x17   : > { %s134_s6 = scalar_lea.sflag [#allocation3], %s642_s25  ;;  %p420_p2 = pneg %p651_p13 }
  0x18   : > { %s431_s7 = scalar_lea.vmem %s146_s4, 32  ;;  %s560_s8 = smov [#allocation2]  }
  0x19   : > { %p432_p3 = scmp.ne.s32.totalorder %s146_s4, %s431_s7  ;;  %s436_s15 = sshll.u32 %s560_s8, 4  ;;  %s437_s15 = int_to_ptr.vmem [resolvable:$false] %s436_s15 }
  0x1a   : > { %s438_s16 = scalar_lea.vmem %s437_s15, 64  ;;  %p439_p4 = scmp.lt.s32.totalorder %s146_s4, %s437_s15 }
  0x1b   : > { %p434_p5 = pnand %p432_p3, %p420_p2  ;;  %p440_p7 = scmp.lt.s32.totalorder %s438_s16, %s431_s7 }
  0x1d   : > { %p435_p6 = pneg %p434_p5  ;;  %p441_p10 = por %p440_p7, %p439_p4 }
  0x1f   : > { %p442_p12 = pnand %p441_p10, %p435_p6 }
  0x21   : > { %445 = shalt.err (!%p442_p12)
}
  0x22   : > { %360 = dma.hbm_to_vmem [thread:$0]  (!%p651_p13), %s143_s30, 32, %s146_s4, %s134_s6  }
  0x23   : > { %p669_p3 = pnand %p343_p0, %p167_p1  ;;  %s342_s19 = sshll.u32 %s554_s13, 4 }
  0x24   : > { %s155_s20 = scalar_lea.vmem [#allocation5], %s642_s25  ;;  %s160_s29 = scalar_lea.hbm %s741_s1, %s342_s19 }
  0x25   : > { %s162_s26 = sshll.u32 %s155_s20, 4  ;;  %s153_s3 = scalar_lea.sflag [#allocation6], %s642_s25  ;;  %s163_s26 = int_to_ptr.vmem [resolvable:$true] %s162_s26 }
  0x26   : > { %s459_s7 = scalar_lea.vmem %s163_s26, 16  ;;  %s561_s30 = smov [#allocation5]  }
  0x27   : > { %p460_p5 = scmp.ne.s32.totalorder %s163_s26, %s459_s7  ;;  %s464_s4 = sshll.u32 %s561_s30, 4  ;;  %s465_s4 = int_to_ptr.vmem [resolvable:$false] %s464_s4 }
  0x28   : > { %s466_s6 = scalar_lea.vmem %s465_s4, 32  ;;  %p467_p0 = scmp.lt.s32.totalorder %s163_s26, %s465_s4 }
  0x29   : > { %p462_p6 = pnand %p460_p5, %p420_p2  ;;  %p468_p1 = scmp.lt.s32.totalorder %s466_s6, %s459_s7 }
  0x2b   : > { %p463_p4 = pneg %p462_p6  ;;  %p469_p7 = por %p468_p1, %p467_p0 }
  0x2d   : > { %p470_p10 = pnand %p469_p7, %p463_p4 }
  0x2f   : > { %473 = shalt.err (!%p470_p10)
}
  0x30   : > { %363 = dma.hbm_to_vmem [thread:$0]  (!%p651_p13), %s160_s29, 16, %s163_s26, %s153_s3  }
  0x31   : > { %171 = sbr.rel (%p669_p3) target bundleno = 81 (0x51), region = 28  ;;  %s687_s25 = sand.u32 (!%p669_p3), 1, %s542_s10  }
  0x32   : > { %s344_s8 = sshll.u32 (!%p669_p3), %s687_s25, 1  ;;  %s174_s15 = scalar_lea.sflag (!%p669_p3), [#allocation3], %s687_s25 }
  0x33   : > { %s177_s16 = scalar_lea.vmem (!%p669_p3), [#allocation2], %s344_s8 }
  0x36   : > { %525 = dma.done.wait (%p625_p8), %s174_s15, 32  }
  0x37   : > { %527 = vsyncadd (%p625_p8), %s174_s15, 4294967264  ;;  %s183_s5 = scalar_lea.sflag [#allocation6], %s687_s25  ;;  %s185_s18 = scalar_lea.vmem [#allocation5], %s687_s25 }
  0x38   : > { %529 = dma.done.wait (%p625_p8), %s183_s5, 16  }
  0x39   : > { %531 = vsyncadd (%p625_p8), %s183_s5, 4294967280  ;;  %s209_s19 = scalar_lea.vmem [#allocation7], %s344_s8  ;;  %s348_s26 = sshll.u32 %s550_s12, 5  ;;  %v210_v0 = vld [vmem:[%s177_s16] sm:$0x3]  ;;  %vm219_vm0 = vcmask 238592  }
  0x3a   : > { %s236_s20 = sshll.u32 %s209_s19, 4  ;;  %v346_v1 = vld [vmem:[%s185_s18] ss:$0 sm:$0xff]  ;;  %s234_s29 = scalar_lea.hbm %s742_s2, %s348_s26  ;;  %s237_s20 = int_to_ptr.vmem [resolvable:$true] %s236_s20 }
  0x3b   : > { %v218_v2 = vmul.f32 %v346_v1, %v210_v0  ;;  %s222_s3 = scalar_lea.sflag [#allocation4], %s687_s25  ;;  %s474_s7 = scalar_lea.vmem %s237_s20, 32 }
  0x3c   : > { %p475_p13 = scmp.ne.s32.totalorder %s237_s20, %s474_s7  ;;  %s562_s21 = smov [#allocation7]  }
  0x3d   : > { %220 = vst.msk [vmem:[%s209_s19] sm:$0x3] %vm219_vm0, %v218_v2  ;;  %s478_s30 = sshll.u32 %s562_s21, 4  ;;  %s479_s30 = int_to_ptr.vmem [resolvable:$false] %s478_s30 }
  0x3e   : > { %p476_p8 = pnand %p475_p13, %p629_p9  ;;  %s480_s12 = scalar_lea.vmem %s479_s30, 64 }
  0x3f   : > { %p481_p12 = scmp.lt.s32.totalorder %s237_s20, %s479_s30  ;;  %p482_p3 = scmp.lt.s32.totalorder %s480_s12, %s474_s7 }
  0x40   : > { %p477_p2 = pneg %p476_p8 }
  0x41   : > { %p483_p5 = por %p482_p3, %p481_p12 }
  0x43   : > { %p484_p6 = pnand %p483_p5, %p477_p2 }
  0x45   : > { %487 = shalt.err (!%p484_p6)
}
  0x46   : > { %s488_s4 = scalar_lea.hbm %s234_s29, 32  ;;  %s492_s8 = scalar_lea.hbm %s742_s2, 128 }
  0x47   : > { %p489_p4 = scmp.ne.s32.totalorder %s234_s29, %s488_s4  ;;  %p493_p7 = scmp.lt.s32.totalorder %s234_s29, %s742_s2 }
  0x48   : > { %p494_p10 = scmp.lt.s32.totalorder %s492_s8, %s488_s4 }
  0x49   : > { %p490_p0 = pnand %p489_p4, %p629_p9 }
  0x4a   : > { %p495_p13 = por %p494_p10, %p493_p7 }
  0x4b   : > { %p491_p1 = pneg %p490_p0 }
  0x4d   : > { %p496_p8 = pnand %p495_p13, %p491_p1 }
  0x4f   : > { %499 = shalt.err (!%p496_p8)
}
  0x50   : > { %355 = dma.vmem_to_hbm [thread:$0]  (%p629_p9), %s237_s20, 32, %s234_s29, %s222_s3  }
  0x51 PF: > { %p369_p2 = scmp.ge.s32.totalorder %s558_s14, 2  ;;  %s248_s5 = sand.u32 1, %s538_s9  }
  0x52   : > { %s249_s18 = scalar_lea.sflag [#allocation4], %s248_s5 }
  0x53   : > { %p365_p12 = pnand %p369_p2, %p636_p11 }
  0x55   : > { %p366_p3 = pneg %p365_p12 }
  0x57   : > { %533 = dma.done.wait (%p366_p3), %s249_s18, 32  }
  0x58   : > { %535 = vsyncadd (%p366_p3), %s249_s18, 4294967264  ;;  %s21_s14 = sadd.s32 1, %s558_s14   ;;  %s749_s9 = smov %s542_s10 }
  0x59   : > { %p18_p5 = scmp.ge.s32.totalorder %s21_s14, 6   ;;  %s750_s10 = smov %s546_s11 }
  0x5a   : > { %s751_s11 = smov %s634_s23  ;;  %s752_s12 = smov %s554_s13 }
  0x5b   : > { %s753_s13 = smov %s755_s17  ;;  %20 = sbr.rel (!%p18_p5) target bundleno = 8 (0x8), region = 86 }
  0x60   :  { %254 = vsyncpa [#allocation3], 1 }
  0x61   :  { %256 = vsyncpa [#allocation3 + $0x1], 1 }
  0x62   :  { %257 = vsyncpa [#allocation6], 1 }
  0x63   :  { %259 = vsyncpa [#allocation6 + $0x1], 1 }
  0x64   :  { %260 = vsyncpa [#allocation4], 1 }
  0x65   :  { %262 = vsyncpa [#allocation4 + $0x1], 1 }

</bundles_post_ra>
